<compile_context>
chip_gen: v5e
topology: v5e:2x2
jax: 0.10.0
libtpu: 0.0.40
codegen_flags: <defaults>
</compile_context>

<pallas_src>
import functools
import math

import jax
import jax.numpy as jnp
from jax import lax
from jax.experimental import pallas as pl
from jax.experimental.pallas import tpu as pltpu

_LN_EPS = 1e-5       # nn.LayerNorm default
_NORM_EPS = 1e-12    # F.normalize default
_NEG_BIG = -1e30     # head-mask fill value for the fused softmax


# --------------------------------------------------------------------------
# Small in-kernel helpers
# --------------------------------------------------------------------------
def _erf(x):
    # TODO(synk): PyTorch F.gelu uses exact erf; Mosaic has no guaranteed erf
    # lowering, so use Abramowitz & Stegun 7.1.26 (|abs err| < 1.5e-7).
    a1, a2, a3, a4, a5 = 0.254829592, -0.284496736, 1.421413741, -1.453152027, 1.061405429
    p = 0.3275911
    sgn = jnp.where(x >= 0.0, 1.0, -1.0)
    z = jnp.abs(x)
    tt = 1.0 / (1.0 + p * z)
    poly = ((((a5 * tt + a4) * tt + a3) * tt + a2) * tt + a1) * tt
    return sgn * (1.0 - poly * jnp.exp(-z * z))


def _axis_mask(coord, delta, size):
    """Validity mask (1, n) for reading coordinate coord+delta (None == all valid)."""
    if delta < 0:
        return coord >= -delta
    if delta > 0:
        return coord <= size - 1 - delta
    return None


def _and_masks(*ms):
    out = None
    for mm in ms:
        if mm is None:
            continue
        out = mm if out is None else (out & mm)
    return out


def _conv_offsets(lane, dhw, kd, kh, kw):
    """Flat lane offsets + boundary masks for a (kd,kh,kw) depthwise stencil.

    Tap order is (dz, dh, dw) row-major, matching reshape(-1) of the PyTorch
    conv weight's trailing kernel dims.
    """
    D, H, W = dhw
    j = lane % W
    i = (lane // W) % H
    z = lane // (W * H)
    offs = []
    for zz in range(kd):
        dz = zz - (kd // 2)
        mz = _axis_mask(z, dz, D)
        for hh in range(kh):
            dh = hh - (kh // 2)
            mh = _axis_mask(i, dh, H)
            for ww in range(kw):
                dw = ww - (kw // 2)
                mw = _axis_mask(j, dw, W)
                offs.append((dz * H * W + dh * W + dw, _and_masks(mz, mh, mw)))
    return offs


def _depthwise_roll(x, taps, offsets, n, roll_like_jnp):
    """Depthwise conv on a (CH, n) slab: lane rolls + masked VPU FMAs.

    shifted[ch, l] = x[ch, (l + off) mod n], with positions whose stencil
    coordinate is out of range (zero padding) masked off.
    """
    acc = jnp.zeros_like(x)
    for idx, (off, mask) in enumerate(offsets):
        if off == 0:
            shifted = x
        else:
            shift = (-off) % n if roll_like_jnp else off % n
            shifted = pltpu.roll(x, shift, 1)
        if mask is not None:
            shifted = jnp.where(mask, shifted, 0.0)
        acc = acc + taps[:, idx:idx + 1] * shifted
    return acc


def _full_spec(shape):
    zeros = (0,) * len(shape)
    return pl.BlockSpec(shape, lambda i, _z=zeros: _z)


@functools.lru_cache(maxsize=None)
def _pltpu_roll_like_jnp():
    """True iff pltpu.roll(x, s, axis) == jnp.roll(x, s, axis) on this backend."""
    x = jnp.arange(8 * 128, dtype=jnp.float32).reshape(8, 128)

    def kern(x_ref, o_ref):
        o_ref[...] = pltpu.roll(x_ref[...], 3, 1)

    y = pl.pallas_call(kern, out_shape=jax.ShapeDtypeStruct((8, 128), jnp.float32))(x)
    return bool(jnp.array_equal(y, jnp.roll(x, 3, 1)))


# --------------------------------------------------------------------------
# Fused SATB kernel: LN1 -> qkv -> dw(1,3,3) -> MHSA + project_out + residual
#                 -> LN2 -> GDFN (1x1x1 -> dw 3x3x3 -> gelu gate -> 1x1x1)
#                 + residual -> SpectralEnhancement.   One batch per grid step.
# --------------------------------------------------------------------------
def _satb_kernel(x_ref, g1_ref, b1_ref, wqkv_ref, tap9_ref, temp_ref, wpo_ref,
                 g2_ref, b2_ref, win_ref, tap27_ref, wout_ref, wse_ref, bse_ref,
                 o_ref, *, t, dhw, nh, hd, m, hp, roll_like_jnp):
    D, H, W = dhw
    n = D * H * W
    f32 = jnp.float32
    x = x_ref[0].astype(f32)                               # (t, n)

    # ---- LayerNorm1 over the channel (t) axis, per spatial position ----
    mu = jnp.mean(x, axis=0, keepdims=True)
    d = x - mu
    var = jnp.mean(d * d, axis=0, keepdims=True)           # biased, like torch
    y = d * lax.rsqrt(var + _LN_EPS) * g1_ref[...] + b1_ref[...]

    # ---- 1x1x1 qkv conv (channel matmul) + depthwise (1,3,3) conv ----
    qkv = jnp.dot(wqkv_ref[...], y, preferred_element_type=f32)        # (3t, n)
    lane = lax.broadcasted_iota(jnp.int32, (1, n), 1)
    qkv = _depthwise_roll(qkv, tap9_ref[...],
                          _conv_offsets(lane, dhw, 1, 3, 3), n, roll_like_jnp)
    q2d = qkv[0:t]
    k2d = qkv[t:2 * t]
    v2d = qkv[2 * t:3 * t]

    # ---- MHSA3D in the native (t, n) layout ----
    # PyTorch's attention view is a raw regrouping
    #     q_att[r, jj*n + s] = q2d[r*m + jj, s]       (r in [0,c), jj in [0,m))
    # so per-head scores / softmax / apply / project_out reduce to (t, t)
    # matmuls with the constant group matrix  B[a,b] = (a//m == b//m)  and the
    # Kronecker mask  M[a,b] = (a%m == b%m).  No relayout is ever needed.
    qss = jnp.sum(q2d * q2d, axis=1, keepdims=True)        # (t, 1)
    kss = jnp.sum(k2d * k2d, axis=1, keepdims=True)
    if m > 1 or nh > 1:
        ti_r = lax.broadcasted_iota(jnp.int32, (t, t), 0)
        ti_c = lax.broadcasted_iota(jnp.int32, (t, t), 1)
    if m > 1:
        grp_b = ((ti_r // m) == (ti_c // m)).astype(f32)   # (t, t)
        mask_m = (ti_r % m) == (ti_c % m)
        qss = jnp.dot(grp_b, qss, preferred_element_type=f32)   # per-group sums
        kss = jnp.dot(grp_b, kss, preferred_element_type=f32)

    # F.normalize (eps clamp) + per-head temperature folded into row scalings.
    qs = q2d * (temp_ref[...] / jnp.maximum(jnp.sqrt(qss), _NORM_EPS))
    ks = k2d * (1.0 / jnp.maximum(jnp.sqrt(kss), _NORM_EPS))
    g_full = lax.dot_general(qs, ks, (((1,), (1,)), ((), ())),
                             preferred_element_type=f32)   # (t, t)
    if m > 1:
        s_att = jnp.dot(jnp.dot(grp_b, jnp.where(mask_m, g_full, 0.0),
                                preferred_element_type=f32),
                        grp_b, preferred_element_type=f32)
    else:
        s_att = g_full
    if nh > 1:
        same_head = (ti_r // (m * hd)) == (ti_c // (m * hd))
        s_att = jnp.where(same_head, s_att, _NEG_BIG)
    s_att = s_att - jnp.max(s_att, axis=-1, keepdims=True)
    p_exp = jnp.exp(s_att)
    if m > 1:
        denom = jnp.sum(jnp.where((ti_c % m) == 0, p_exp, 0.0),
                        axis=-1, keepdims=True)
        q_mat = jnp.where(mask_m, p_exp / denom, 0.0)
    else:
        q_mat = p_exp / jnp.sum(p_exp, axis=-1, keepdims=True)
    # project_out folded in:  attn_out = W_po @ Q @ v2d
    attn = jnp.dot(jnp.dot(wpo_ref[...], q_mat, preferred_element_type=f32),
                   v2d, preferred_element_type=f32)
    x1 = x + attn                                          # residual

    # ---- LayerNorm2 + GDFN3D ----
    mu2 = jnp.mean(x1, axis=0, keepdims=True)
    d2 = x1 - mu2
    var2 = jnp.mean(d2 * d2, axis=0, keepdims=True)
    y2 = d2 * lax.rsqrt(var2 + _LN_EPS) * g2_ref[...] + b2_ref[...]
    pin = jnp.dot(win_ref[...], y2, preferred_element_type=f32)        # (2hp, n)
    dwc = _depthwise_roll(pin, tap27_ref[...],
                          _conv_offsets(lane, dhw, 3, 3, 3), n, roll_like_jnp)
    x1g = dwc[0:hp]                                        # padded rows are zero
    x2g = dwc[hp:2 * hp]
    gated = 0.5 * x1g * (1.0 + _erf(x1g * (1.0 / math.sqrt(2.0)))) * x2g
    x2 = x1 + jnp.dot(wout_ref[...], gated, preferred_element_type=f32)

    # ---- SpectralEnhancement: x * sigmoid(W @ mean_{c,h,w}(x) + b) ----
    mch = jnp.mean(x2, axis=1, keepdims=True)              # (t, 1)
    se = jnp.dot(wse_ref[...], mch, preferred_element_type=f32) + bse_ref[...]
    o_ref[0] = (x2 * (1.0 / (1.0 + jnp.exp(-se)))).astype(o_ref.dtype)


# --------------------------------------------------------------------------
# SATB forward.  x: (b, t, c, h, w) with t == `channels` of the module.
# --------------------------------------------------------------------------
def satb_forward(x, params, num_heads=1, roll_like_jnp=True):
    b, t, c, h, w = x.shape
    n = c * h * w
    na = h * w * t
    assert c % num_heads == 0, "num_heads must divide the depth axis c"
    hd = c // num_heads
    # The attention view is a raw reshape; folding it back into the (t, n)
    # layout requires na % n == 0, i.e. c | t.
    # TODO(synk): general c-not-dividing-t would need per-column regrouping.
    assert na % n == 0, "requires c | t (depth divides the channel count)"
    m = na // n

    x2d = x.reshape(b, t, n)

    # ---- kernel-ready weight views (tiny XLA ops, fused under jit) ----
    g1 = params["g1"].reshape(t, 1)
    b1 = params["b1"].reshape(t, 1)
    g2 = params["g2"].reshape(t, 1)
    b2 = params["b2"].reshape(t, 1)
    b_se = params["b_se"].reshape(t, 1)
    qkv_taps = params["w_qkv_dw"].reshape(3 * t, 9)
    # per-row temperature: channel row ti belongs to head ti // (m*hd)
    temp_ti = jnp.repeat(params["temperature"].reshape(num_heads),
                         m * hd).reshape(t, 1)

    # GDFN weights zero-padded so the x1/x2 split is sublane-tile aligned.
    two_hidden = params["w_in"].shape[0]
    hidden = two_hidden // 2
    hp = ((hidden + 7) // 8) * 8
    pad = hp - hidden
    w_in_p = jnp.concatenate([
        jnp.pad(params["w_in"][:hidden], ((0, pad), (0, 0))),
        jnp.pad(params["w_in"][hidden:], ((0, pad), (0, 0)))], axis=0)
    tap3 = params["w_dw"].reshape(two_hidden, 27)
    tap3_p = jnp.concatenate([
        jnp.pad(tap3[:hidden], ((0, pad), (0, 0))),
        jnp.pad(tap3[hidden:], ((0, pad), (0, 0)))], axis=0)
    w_out_p = jnp.pad(params["w_out"], ((0, 0), (0, pad)))

    kern = functools.partial(_satb_kernel, t=t, dhw=(c, h, w), nh=num_heads,
                             hd=hd, m=m, hp=hp, roll_like_jnp=roll_like_jnp)
    slab = pl.BlockSpec((1, t, n), lambda i: (i, 0, 0))
    weights = [g1, b1, params["w_qkv"], qkv_taps, temp_ti, params["w_attn_out"],
               g2, b2, w_in_p, tap3_p, w_out_p, params["w_se"], b_se]
    out2d = pl.pallas_call(
        kern,
        out_shape=jax.ShapeDtypeStruct((b, t, n), x.dtype),
        grid=(b,),
        in_specs=[slab] + [_full_spec(wt.shape) for wt in weights],
        out_specs=slab,
        compiler_params=pltpu.CompilerParams(dimension_semantics=("parallel",)),
    )(x2d, *weights)
    return out2d.reshape(b, t, c, h, w)


# --------------------------------------------------------------------------
# Parameters (shapes mirror the PyTorch module; values deterministic).
# --------------------------------------------------------------------------
def init_params(key, channels, num_heads=1, expansion_factor=2.66):
    hidden = int(channels * expansion_factor)
    ks = jax.random.split(key, 12)

    def w(k, shape, scale=0.1):
        return scale * jax.random.normal(k, shape, jnp.float32)

    return dict(
        g1=1.0 + 0.05 * jax.random.normal(ks[0], (channels,), jnp.float32),
        b1=0.05 * jax.random.normal(ks[1], (channels,), jnp.float32),
        g2=1.0 + 0.05 * jax.random.normal(ks[2], (channels,), jnp.float32),
        b2=0.05 * jax.random.normal(ks[3], (channels,), jnp.float32),
        temperature=jnp.ones((1, num_heads, 1, 1), jnp.float32),   # as in __init__
        w_qkv=w(ks[4], (3 * channels, channels)),            # Conv3d 1x1x1 (no bias)
        w_qkv_dw=w(ks[5], (3 * channels, 3, 3)),              # depthwise (1,3,3)
        w_attn_out=w(ks[6], (channels, channels)),            # Conv3d 1x1x1
        w_in=w(ks[7], (2 * hidden, channels)),                 # Conv3d 1x1x1
        w_dw=w(ks[8], (2 * hidden, 3, 3, 3)),                  # depthwise (3,3,3)
        w_out=w(ks[9], (channels, hidden)),                    # Conv3d 1x1x1
        w_se=w(ks[10], (channels, channels)),                  # SE Conv3d 1x1x1
        b_se=0.05 * jax.random.normal(ks[11], (channels,), jnp.float32),
    )


# --------------------------------------------------------------------------
# Pure-JAX reference of the PyTorch module (for correctness checking only).
# --------------------------------------------------------------------------
def _depthwise_conv_ref(x5, wt, pads):
    pd, ph, pw = pads
    kd, kh, kw = wt.shape[1:]
    D, H, W = x5.shape[2:]
    xp = jnp.pad(x5, ((0, 0), (0, 0), (pd, pd), (ph, ph), (pw, pw)))
    out = jnp.zeros_like(x5)
    for zz in range(kd):
        for hh in range(kh):
            for ww in range(kw):
                out = out + (wt[:, zz, hh, ww][None, :, None, None, None] *
                             xp[:, :, zz:zz + D, hh:hh + H, ww:ww + W])
    return out


def _layernorm_ref(x2d, g, bb):
    mu = jnp.mean(x2d, axis=1, keepdims=True)
    var = jnp.mean((x2d - mu) ** 2, axis=1, keepdims=True)
    return ((x2d - mu) / jnp.sqrt(var + _LN_EPS)) * g.reshape(1, -1, 1) + bb.reshape(1, -1, 1)


def satb_reference(x, params, num_heads=1):
    b, t, c, h, w = x.shape
    n = c * h * w
    na = h * w * t
    x2d = x.reshape(b, t, n)

    # attention branch
    y = _layernorm_ref(x2d, params["g1"], params["b1"])
    qkv = jnp.einsum("ot,btn->bon", params["w_qkv"], y).reshape(b, 3 * t, c, h, w)
    qkv = _depthwise_conv_ref(qkv, params["w_qkv_dw"].reshape(3 * t, 1, 3, 3), (0, 1, 1))
    q5, k5, v5 = qkv[:, :t], qkv[:, t:2 * t], qkv[:, 2 * t:]
    qa = q5.reshape(b, num_heads, -1, na)
    ka = k5.reshape(b, num_heads, -1, na)
    va = v5.reshape(b, num_heads, -1, na)

    def _l2n(z):
        return z / jnp.maximum(jnp.linalg.norm(z, axis=-1, keepdims=True), _NORM_EPS)

    att = jnp.einsum("bgid,bgjd->bgij", _l2n(qa), _l2n(ka))
    att = att * params["temperature"].reshape(1, num_heads, 1, 1)
    att = jax.nn.softmax(att, axis=-1)
    av = jnp.einsum("bgij,bgjd->bgid", att, va).reshape(b, t, c, h, w)
    x5 = x + jnp.einsum("ot,btchw->bochw", params["w_attn_out"], av)

    # GDFN branch
    y = _layernorm_ref(x5.reshape(b, t, n), params["g2"], params["b2"])
    hid2 = params["w_in"].shape[0]
    p5 = jnp.einsum("ot,btn->bon", params["w_in"], y).reshape(b, hid2, c, h, w)
    p5 = _depthwise_conv_ref(p5, params["w_dw"], (1, 1, 1))
    x1g, x2g = p5[:, :hid2 // 2], p5[:, hid2 // 2:]
    gated = jax.nn.gelu(x1g, approximate=False) * x2g
    x5 = x5 + jnp.einsum("oh,bhcxy->bocxy", params["w_out"], gated)

    # SpectralEnhancement
    avg = jnp.mean(x5, axis=(2, 3, 4), keepdims=True)
    se = jnp.einsum("ot,btxyz->boxyz", params["w_se"], avg) + params["b_se"].reshape(1, t, 1, 1, 1)
    return x5 * jax.nn.sigmoid(se)


if __name__ == "__main__":
    key = jax.random.PRNGKey(0)
    # SATB(channels=8): input (b, t=channels, c, h, w); needs c | t, nh | c.
    b, t, c, h, w = 2, 8, 4, 8, 8
    num_heads = 1

    kp, kx = jax.random.split(key)
    params = init_params(kp, channels=t, num_heads=num_heads, expansion_factor=2.66)
    x = jax.random.normal(kx, (b, t, c, h, w), jnp.float32)

    fwd = jax.jit(functools.partial(satb_forward, num_heads=num_heads,
                                    roll_like_jnp=_pltpu_roll_like_jnp()))
    y = fwd(x, params)
    jax.block_until_ready(y)

    assert y.shape == (b, t, c, h, w) and y.dtype == jnp.float32
    ref = satb_reference(x, params, num_heads=num_heads)
    err = float(jnp.max(jnp.abs(y - ref)))
    scale = float(jnp.max(jnp.abs(ref)))
    assert err <= 1e-3 * scale + 1e-3, f"kernel/reference mismatch: {err} (scale {scale})"
    print("KERNEL_OK")
</pallas_src>

<mosaic_0001>
module attributes {stable_mosaic.version = 11 : i64} {
  func.func @kern(%arg0: memref<8x128xf32, #tpu.memory_space<vmem>>, %arg1: memref<8x128xf32, #tpu.memory_space<vmem>>) attributes {dimension_semantics = [], scalar_prefetch = 0 : i64, scratch_operands = 0 : i64, tpu.core_type = #tpu.core_type<tc>} {
    %c0 = arith.constant 0 : index
    %c0_0 = arith.constant 0 : index
    %0 = vector.load %arg0[%c0, %c0_0] : memref<8x128xf32, #tpu.memory_space<vmem>>, vector<8x128xf32>
    %c3_i32 = arith.constant 3 : i32
    %1 = tpu.dynamic_rotate %0 by %c3_i32 dim 1 : vector<8x128xf32>, i32 -> vector<8x128xf32>
    %c0_1 = arith.constant 0 : index
    %c0_2 = arith.constant 0 : index
    %2 = vector.load %arg1[%c0_1, %c0_2] : memref<8x128xf32, #tpu.memory_space<vmem>>, vector<8x128xf32>
    tpu.vector_store %arg1[%c0_1, %c0_2], %1 {strides = array<i32>} : memref<8x128xf32, #tpu.memory_space<vmem>>, vector<8x128xf32>,
    return
  }
}

</mosaic_0001>

<bundles_post_ra>
// kernel: tpu_custom_call.1
= control target key start
LH: loop header
LB: loop body
LE: loop exit
PB: predicated region body
PF: predicated region fallthrough
CT: control target
= control target key end

     0   :  { %6 = vsyncpa [#allocation3], 0  ;;  %s118_s0 = inlined_call_operand.hbm [shape: f32[8,128], index: 0, kind: input, shape index: {}]   ;;  %s119_s1 = inlined_call_operand.hbm [shape: f32[8,128], index: 1, kind: output, shape index: {}]  }
   0x1   :  { %7 = vsyncpa [#allocation4], 0  ;;  %s13_s8 = sshll.u32 %s118_s0, 4  ;;  %s99_s9 = smov [#allocation2]   ;;  %s14_s8 = int_to_ptr.hbm [resolvable:$true] %s13_s8 }
   0x2   :  { %s15_s10 = sshll.u32 %s99_s9, 4  ;;  %s16_s10 = int_to_ptr.vmem [resolvable:$true] %s15_s10 }
   0x3   :  { %18 = dma.hbm_to_vmem [thread:$0]  %s14_s8, 128, %s16_s10, [#allocation3]  }
   0x4   :  { %95 = dma.done.wait [#allocation3], 128  }
   0x5   :  { %96 = vsyncadd [#allocation3], 4294967168  ;;  %v23_v0 = vld [vmem:[#allocation2] sm:$0xff]  ;;  %s100_s11 = smov 3   ;;  %s101_s12 = smov [#allocation5]  }
   0x6   :  { %24 = vrot.lane.b32.xlu0 %v23_v0, %s100_s11  ;;  %s32_s13 = sshll.u32 %s101_s12, 4  ;;  %s34_s16 = sshll.u32 %s119_s1, 4  ;;  %s33_s13 = int_to_ptr.vmem [resolvable:$true] %s32_s13  ;;  %s35_s16 = int_to_ptr.hbm [resolvable:$true] %s34_s16 }
  0x78   :  { %v25_v1 = vpop.permute.xlu0 %24 }
  0x79   :  { %26 = vst [vmem:[#allocation5] sm:$0xff] %v25_v1 }
  0x7a   :  { %37 = dma.vmem_to_hbm [thread:$0]  %s33_s13, 128, %s35_s16, [#allocation4]  }
  0x7b   :  { %97 = dma.done.wait [#allocation4], 128  }
  0x7c   :  { %98 = vsyncadd [#allocation4], 4294967168 }
  0x7d   :  { %42 = vsyncpa [#allocation3], 1 }
  0x7e   :  { %43 = vsyncpa [#allocation4], 1 }

</bundles_post_ra>
